<compile_context>
chip_gen: v5e
topology: v5e:2x2
jax: 0.10.0
libtpu: 0.0.40
codegen_flags: <defaults>
</compile_context>

<pallas_src>
import jax
import jax.numpy as jnp
from jax import lax
from jax.experimental import pallas as pl
from jax.experimental.pallas import tpu as pltpu

NA_PRIMITIVES = ("gcn", "sage_mean", "gin_sum", "linear")
SC_PRIMITIVES = ("none", "skip")
LA_PRIMITIVES = ("l_max", "l_mean", "l_concat")

NUM_NA = len(NA_PRIMITIVES)


def _vspec():
    return pl.BlockSpec(memory_space=pltpu.MemorySpace.VMEM)


def _sspec():
    return pl.BlockSpec(memory_space=pltpu.MemorySpace.SMEM)


# --------------------------- fused Pallas kernel ---------------------------

def _fused_forward_kernel(sc_ref,                       # SMEM [2] skip weights (f32)
                          x_ref, a_hat_ref, d_is_ref, d_inv_ref,
                          lin1_w_ref, lin1_b_ref,
                          na_w_ref, na_b_ref, na_s_ref,
                          la_w_ref, la_b_ref,
                          pool_ref, cls_w_ref, cls_b_ref,
                          o_ref):
    f32 = jnp.float32
    bf16 = jnp.bfloat16

    n = x_ref.shape[0]
    h = lin1_w_ref.shape[1]

    a_hat = a_hat_ref[...]           # bf16 [N, N]  A + I (0/1 -> exact)
    d_is = d_is_ref[...]             # f32  [N, 1]  deg^{-1/2}
    d_inv = d_inv_ref[...]           # f32  [N, 1]  deg^{-1}

    # Column-block masks over the stacked [N, 4H] per-primitive activations
    # (hoisted: computed once, reused by all three NA layers).
    col = lax.broadcasted_iota(jnp.int32, (n, NUM_NA * h), 1)
    in_gcn = col < h
    in_sage = col < 2 * h
    in_prop = col < 3 * h            # gcn | sage | gin go through A_hat; linear does not
    post_scale = jnp.where(in_gcn, d_is, jnp.where(in_sage, d_inv, 1.0))

    # lin1 (dropout is identity in eval mode).  bf16 MXU, f32 accumulate.
    x = jnp.dot(x_ref[...], lin1_w_ref[...],
                preferred_element_type=f32) + lin1_b_ref[...]

    def na_mixed(v, layer):
        # One lane-dense [N,H]@[H,4H] bf16 matmul covering all four primitive weights.
        z = jnp.dot(v.astype(bf16), na_w_ref[layer], preferred_element_type=f32)
        # gcn pre-scaling by D^{-1/2} (f32 VPU); sage/gin unscaled ('linear'
        # block's A_hat product is discarded below, so its contents don't matter).
        pre = jnp.where(in_gcn, d_is * z, z)
        prop = jnp.dot(a_hat, pre.astype(bf16), preferred_element_type=f32)
        # Per-primitive diagonal post-scaling on the VPU; 'linear' (adj = I)
        # bypasses the A_hat matmul entirely and takes z directly.
        mixed = jnp.where(in_prop, post_scale * prop, z)
        act = jnp.maximum(mixed + na_b_ref[layer], 0.0)     # bias after propagation
        # Alpha-weighted combine of the 4 primitive blocks via a block-diagonal
        # [4H, H] matrix (alphas folded in host-side) -> single MXU matmul.
        return jnp.dot(act.astype(bf16), na_s_ref[layer], preferred_element_type=f32)

    x1 = na_mixed(x, 0)
    x2 = na_mixed(x1, 1)
    x3 = na_mixed(x2, 2)

    # ScMixedOp over ('none','skip'): 'none' contributes 0, 'skip' scales.
    sc0 = sc_ref[0]
    sc1 = sc_ref[1]
    y1 = sc0 * x1
    y2 = sc1 * x2
    y3 = x3                           # fix_last=False: x3 passes through raw

    relu = lambda t: jnp.maximum(t, 0.0)
    a_max = relu(jnp.maximum(jnp.maximum(y3, y1), y2))
    a_mean = relu((y1 + y2 + y3) * (1.0 / 3.0))

    # LaMixedOp: one K-concatenated [N,5H]@[5H,H] bf16 matmul (la alphas folded
    # into the weights host-side); the lane concat lands on XLU/VPU slack.
    lhs = jnp.concatenate([a_max, a_mean, relu(y3), relu(y1), relu(y2)], axis=-1)
    x5 = jnp.dot(lhs.astype(bf16), la_w_ref[...],
                 preferred_element_type=f32) + la_b_ref[...]

    # global_mean_pool as matmul with the (1/count)-weighted membership matrix,
    # then the classifier Linear — both fused here.
    pooled = jnp.dot(pool_ref[...], x5.astype(bf16), preferred_element_type=f32)
    o_ref[...] = jnp.dot(pooled.astype(bf16), cls_w_ref[...],
                         preferred_element_type=f32) + cls_b_ref[...]


# ------------------------------ glue (JAX) --------------------------------

def l2_normalize(a, eps=1e-12):
    # F.normalize(a, p=2, dim=-1)
    return a / jnp.maximum(jnp.linalg.norm(a, axis=-1, keepdims=True), eps)


def build_graph_operands(edge_index, n):
    """Single dense A_hat plus per-primitive diagonal scalings."""
    a = jnp.zeros((n, n), jnp.float32).at[edge_index[0], edge_index[1]].set(1.0)
    a = jnp.maximum(a, a.T)                       # undirected
    a_hat = a + jnp.eye(n, dtype=jnp.float32)     # add self-loops
    deg = jnp.maximum(a_hat.sum(-1), 1.0)
    d_is = (1.0 / jnp.sqrt(deg)).reshape(n, 1)    # gcn normalization
    d_inv = (1.0 / deg).reshape(n, 1)             # sage mean normalization
    return a_hat, d_is, d_inv


def build_pool_mat(batch, num_graphs):
    onehot = (batch[None, :] == jnp.arange(num_graphs)[:, None]).astype(jnp.float32)
    counts = jnp.maximum(onehot.sum(-1, keepdims=True), 1.0)
    return onehot / counts


def init_params(key, in_dim, hidden, out_dim, num_layers=3):
    num_na = len(NA_PRIMITIVES)
    num_sc = len(SC_PRIMITIVES)
    num_la = len(LA_PRIMITIVES)
    ks = jax.random.split(key, 16)

    def dense(k, fan_in, shape):
        return jax.random.normal(k, shape, jnp.float32) / jnp.sqrt(float(fan_in))

    params = {
        "lin1_w": dense(ks[0], in_dim, (in_dim, hidden)),
        "lin1_b": jnp.zeros((hidden,), jnp.float32),
        "na1_w": dense(ks[1], hidden, (num_na, hidden, hidden)),
        "na1_b": jnp.zeros((num_na, 1, hidden), jnp.float32),
        "na2_w": dense(ks[2], hidden, (num_na, hidden, hidden)),
        "na2_b": jnp.zeros((num_na, 1, hidden), jnp.float32),
        "na3_w": dense(ks[3], hidden, (num_na, hidden, hidden)),
        "na3_b": jnp.zeros((num_na, 1, hidden), jnp.float32),
        "la_w_max": dense(ks[4], hidden, (hidden, hidden)),
        "la_b_max": jnp.zeros((1, hidden), jnp.float32),
        "la_w_mean": dense(ks[5], hidden, (hidden, hidden)),
        "la_b_mean": jnp.zeros((1, hidden), jnp.float32),
        "la_w_cat": dense(ks[6], 3 * hidden, (3, hidden, hidden)),
        "la_b_cat": jnp.zeros((1, hidden), jnp.float32),
        "cls_w": dense(ks[7], hidden, (hidden, out_dim)),
        "cls_b": jnp.zeros((out_dim,), jnp.float32),
        # arch parameters, exactly as in _initialize_alphas (fix_last=False)
        "na_alphas": 0.001 * jnp.ones((num_layers, num_na), jnp.float32),
        "sc_alphas": 0.001 * jnp.ones((num_layers, num_sc), jnp.float32),
        "la_alphas": 0.001 * jnp.ones((1, num_la), jnp.float32),
    }
    return params


def prepare_kernel_params(params):
    """One-time (per parameter set) weight folding into kernel-ready arrays.

    TODO(synk): eval-mode only — gradients w.r.t. the na/sc/la alphas do not
    flow through this folding if reused for architecture search.
    """
    bf16 = jnp.bfloat16
    na_a = l2_normalize(params["na_alphas"])       # [3, 4]
    sc_a = l2_normalize(params["sc_alphas"])       # [3, 2]
    la_a = l2_normalize(params["la_alphas"])[0]    # [3]

    hidden = params["lin1_w"].shape[1]
    eye = jnp.eye(hidden, dtype=jnp.float32)

    # Column-stack the per-primitive NA weights: [4,H,H] -> lane-dense [H, 4H].
    def stack_w(w):
        return jnp.transpose(w, (1, 0, 2)).reshape(hidden, NUM_NA * hidden)

    def stack_b(b):
        return jnp.transpose(b, (1, 0, 2)).reshape(1, NUM_NA * hidden)

    na_w_stack = jnp.stack([stack_w(params["na1_w"]),
                            stack_w(params["na2_w"]),
                            stack_w(params["na3_w"])]).astype(bf16)     # [3, H, 4H]
    na_b_stack = jnp.stack([stack_b(params["na1_b"]),
                            stack_b(params["na2_b"]),
                            stack_b(params["na3_b"])])                  # [3, 1, 4H] f32
    # Block-diagonal alpha combine matrices: S_l[o*H + i, i] = na_a[l, o].
    na_s = jnp.stack([jnp.kron(na_a[l].reshape(NUM_NA, 1), eye)
                      for l in range(3)]).astype(bf16)                  # [3, 4H, H]

    # LaMixedOp weights (normalized la weights folded in) as ONE [5H, H] block:
    # row-block order matches the in-kernel lhs concat [a_max|a_mean|y3|y1|y2].
    la_w_cat = jnp.concatenate([la_a[0] * params["la_w_max"],
                                la_a[1] * params["la_w_mean"],
                                la_a[2] * params["la_w_cat"][0],        # y3 block
                                la_a[2] * params["la_w_cat"][1],        # y1 block
                                la_a[2] * params["la_w_cat"][2]],       # y2 block
                               axis=0).astype(bf16)                     # [5H, H]
    la_b_comb = (la_a[0] * params["la_b_max"]
                 + la_a[1] * params["la_b_mean"]
                 + la_a[2] * params["la_b_cat"])                        # [1, H] f32

    # ScMixedOp(['none','skip']) reduces to scaling by the 'skip' weight.
    sc_skips = jnp.stack([sc_a[0, 1], sc_a[1, 1]])                      # [2] f32

    return {
        "sc_skips": sc_skips,
        "lin1_w": params["lin1_w"].astype(bf16),
        "lin1_b": params["lin1_b"].reshape(1, hidden),
        "na_w": na_w_stack,
        "na_b": na_b_stack,
        "na_s": na_s,
        "la_w": la_w_cat,
        "la_b": la_b_comb,
        "cls_w": params["cls_w"].astype(bf16),
        "cls_b": params["cls_b"].reshape(1, -1),
    }


def nac_searchspace_forward(prep, x, a_hat, d_is, d_inv, pool_mat):
    g = pool_mat.shape[0]
    out_dim = prep["cls_w"].shape[1]
    bf16 = jnp.bfloat16

    return pl.pallas_call(
        _fused_forward_kernel,
        out_shape=jax.ShapeDtypeStruct((g, out_dim), jnp.float32),
        in_specs=[_sspec()] + [_vspec()] * 14,
        out_specs=_vspec(),
    )(prep["sc_skips"],
      x.astype(bf16), a_hat.astype(bf16), d_is, d_inv,
      prep["lin1_w"], prep["lin1_b"],
      prep["na_w"], prep["na_b"], prep["na_s"],
      prep["la_w"], prep["la_b"],
      pool_mat.astype(bf16), prep["cls_w"], prep["cls_b"])


if __name__ == "__main__":
    # Small graph batch: 2 graphs x 8 nodes = 16 nodes, ring topology per graph.
    # TODO(synk): for real MXU utilization, batch enough graphs that the node
    # count (or per-row tile) is >=128 (v5e) / >=256 (v6e/v7x); demo stays tiny.
    N, IN_DIM, HIDDEN, OUT_DIM, NUM_GRAPHS = 16, 8, 32, 4, 2

    key = jax.random.PRNGKey(0)
    k_x, k_p = jax.random.split(key)

    x = jax.random.normal(k_x, (N, IN_DIM), jnp.float32)

    src, dst = [], []
    nodes_per_graph = N // NUM_GRAPHS
    for gi in range(NUM_GRAPHS):
        off = gi * nodes_per_graph
        for i in range(nodes_per_graph):
            src.append(off + i)
            dst.append(off + (i + 1) % nodes_per_graph)
    edge_index = jnp.array([src, dst], dtype=jnp.int32)
    batch = jnp.array([gi for gi in range(NUM_GRAPHS) for _ in range(nodes_per_graph)],
                      dtype=jnp.int32)

    a_hat, d_is, d_inv = build_graph_operands(edge_index, N)
    pool_mat = build_pool_mat(batch, NUM_GRAPHS)
    params = init_params(k_p, IN_DIM, HIDDEN, OUT_DIM)

    # One-time weight folding outside the jitted forward (params fixed across calls).
    prep = prepare_kernel_params(params)
    prep = jax.tree_util.tree_map(jax.block_until_ready, prep)

    forward = jax.jit(nac_searchspace_forward)
    logits = forward(prep, x, a_hat, d_is, d_inv, pool_mat)
    logits = jax.block_until_ready(logits)
    assert logits.shape == (NUM_GRAPHS, OUT_DIM), logits.shape
    assert bool(jnp.all(jnp.isfinite(logits)))
    print("KERNEL_OK")
</pallas_src>

<mosaic_0001>
module attributes {stable_mosaic.version = 11 : i64} {
  func.func @_fused_forward_kernel(%arg0: memref<2xf32, #tpu.memory_space<smem>>, %arg1: memref<16x8xbf16, #tpu.memory_space<vmem>>, %arg2: memref<16x16xbf16, #tpu.memory_space<vmem>>, %arg3: memref<16x1xf32, #tpu.memory_space<vmem>>, %arg4: memref<16x1xf32, #tpu.memory_space<vmem>>, %arg5: memref<8x32xbf16, #tpu.memory_space<vmem>>, %arg6: memref<1x32xf32, #tpu.memory_space<vmem>>, %arg7: memref<3x32x128xbf16, #tpu.memory_space<vmem>>, %arg8: memref<3x1x128xf32, #tpu.memory_space<vmem>>, %arg9: memref<3x128x32xbf16, #tpu.memory_space<vmem>>, %arg10: memref<160x32xbf16, #tpu.memory_space<vmem>>, %arg11: memref<1x32xf32, #tpu.memory_space<vmem>>, %arg12: memref<2x16xbf16, #tpu.memory_space<vmem>>, %arg13: memref<32x4xbf16, #tpu.memory_space<vmem>>, %arg14: memref<1x4xf32, #tpu.memory_space<vmem>>, %arg15: memref<2x4xf32, #tpu.memory_space<vmem>>) attributes {dimension_semantics = [], scalar_prefetch = 0 : i64, scratch_operands = 0 : i64, tpu.core_type = #tpu.core_type<tc>} {
    %c0 = arith.constant 0 : index
    %c0_0 = arith.constant 0 : index
    %0 = vector.load %arg2[%c0, %c0_0] : memref<16x16xbf16, #tpu.memory_space<vmem>>, vector<16x16xbf16>
    %c0_1 = arith.constant 0 : index
    %c0_2 = arith.constant 0 : index
    %1 = vector.load %arg3[%c0_1, %c0_2] : memref<16x1xf32, #tpu.memory_space<vmem>>, vector<16x1xf32>
    %c0_3 = arith.constant 0 : index
    %c0_4 = arith.constant 0 : index
    %2 = vector.load %arg4[%c0_3, %c0_4] : memref<16x1xf32, #tpu.memory_space<vmem>>, vector<16x1xf32>
    %3 = tpu.iota {dimensions = array<i32: 1>} : vector<16x128xi32>
    %c32_i32 = arith.constant 32 : i32
    %4 = vector.broadcast %c32_i32 : i32 to vector<16x128xi32>
    %5 = arith.cmpi slt, %3, %4 : vector<16x128xi32>
    %c64_i32 = arith.constant 64 : i32
    %6 = vector.broadcast %c64_i32 : i32 to vector<16x128xi32>
    %7 = arith.cmpi slt, %3, %6 : vector<16x128xi32>
    %c96_i32 = arith.constant 96 : i32
    %8 = vector.broadcast %c96_i32 : i32 to vector<16x128xi32>
    %9 = arith.cmpi slt, %3, %8 : vector<16x128xi32>
    %cst = arith.constant 1.000000e+00 : f32
    %10 = vector.shape_cast %2 : vector<16x1xf32> to vector<16x1xf32>
    %11 = vector.broadcast %10 : vector<16x1xf32> to vector<16x128xf32>
    %12 = vector.broadcast %cst : f32 to vector<16x128xf32>
    %13 = arith.select %7, %11, %12 : vector<16x128xi1>, vector<16x128xf32>
    %14 = vector.shape_cast %1 : vector<16x1xf32> to vector<16x1xf32>
    %15 = vector.broadcast %14 : vector<16x1xf32> to vector<16x128xf32>
    %16 = arith.select %5, %15, %13 : vector<16x128xi1>, vector<16x128xf32>
    %c0_5 = arith.constant 0 : index
    %c0_6 = arith.constant 0 : index
    %17 = vector.load %arg1[%c0_5, %c0_6] : memref<16x8xbf16, #tpu.memory_space<vmem>>, vector<16x8xbf16>
    %c0_7 = arith.constant 0 : index
    %c0_8 = arith.constant 0 : index
    %18 = vector.load %arg5[%c0_7, %c0_8] : memref<8x32xbf16, #tpu.memory_space<vmem>>, vector<8x32xbf16>
    %cst_9 = arith.constant dense<0.000000e+00> : vector<16x32xf32>
    %19 = tpu.matmul %17, %18, %cst_9 {dimension_numbers = #tpu.dot_dimension_numbers<[1], [0], [0], [1], [0, 0, 1, 1], [], []>} : vector<16x8xbf16>, vector<8x32xbf16>, vector<16x32xf32> -> vector<16x32xf32>
    %c0_10 = arith.constant 0 : index
    %c0_11 = arith.constant 0 : index
    %20 = vector.load %arg6[%c0_10, %c0_11] : memref<1x32xf32, #tpu.memory_space<vmem>>, vector<1x32xf32>
    %21 = vector.broadcast %20 : vector<1x32xf32> to vector<16x32xf32>
    %22 = arith.addf %19, %21 : vector<16x32xf32>
    %23 = arith.truncf %22 : vector<16x32xf32> to vector<16x32xbf16>
    %c0_12 = arith.constant 0 : index
    %c0_13 = arith.constant 0 : index
    %c0_14 = arith.constant 0 : index
    %24 = vector.load %arg7[%c0_12, %c0_13, %c0_14] : memref<3x32x128xbf16, #tpu.memory_space<vmem>>, vector<1x32x128xbf16>
    %25 = vector.shape_cast %24 : vector<1x32x128xbf16> to vector<32x128xbf16>
    %cst_15 = arith.constant dense<0.000000e+00> : vector<16x128xf32>
    %26 = tpu.matmul %23, %25, %cst_15 {dimension_numbers = #tpu.dot_dimension_numbers<[1], [0], [0], [1], [0, 0, 1, 1], [], []>} : vector<16x32xbf16>, vector<32x128xbf16>, vector<16x128xf32> -> vector<16x128xf32>
    %27 = vector.broadcast %1 : vector<16x1xf32> to vector<16x128xf32>
    %28 = arith.mulf %27, %26 : vector<16x128xf32>
    %29 = arith.select %5, %28, %26 : vector<16x128xi1>, vector<16x128xf32>
    %30 = arith.truncf %29 : vector<16x128xf32> to vector<16x128xbf16>
    %cst_16 = arith.constant dense<0.000000e+00> : vector<16x128xf32>
    %31 = tpu.matmul %0, %30, %cst_16 {dimension_numbers = #tpu.dot_dimension_numbers<[1], [0], [0], [1], [0, 0, 1, 1], [], []>} : vector<16x16xbf16>, vector<16x128xbf16>, vector<16x128xf32> -> vector<16x128xf32>
    %32 = arith.mulf %16, %31 : vector<16x128xf32>
    %33 = arith.select %9, %32, %26 : vector<16x128xi1>, vector<16x128xf32>
    %c0_17 = arith.constant 0 : index
    %c0_18 = arith.constant 0 : index
    %c0_19 = arith.constant 0 : index
    %34 = vector.load %arg8[%c0_17, %c0_18, %c0_19] : memref<3x1x128xf32, #tpu.memory_space<vmem>>, vector<1x1x128xf32>
    %35 = vector.shape_cast %34 : vector<1x1x128xf32> to vector<1x128xf32>
    %36 = vector.broadcast %35 : vector<1x128xf32> to vector<16x128xf32>
    %37 = arith.addf %33, %36 : vector<16x128xf32>
    %cst_20 = arith.constant 0.000000e+00 : f32
    %38 = vector.broadcast %cst_20 : f32 to vector<16x128xf32>
    %39 = arith.maximumf %37, %38 : vector<16x128xf32>
    %40 = arith.truncf %39 : vector<16x128xf32> to vector<16x128xbf16>
    %c0_21 = arith.constant 0 : index
    %c0_22 = arith.constant 0 : index
    %c0_23 = arith.constant 0 : index
    %41 = vector.load %arg9[%c0_21, %c0_22, %c0_23] : memref<3x128x32xbf16, #tpu.memory_space<vmem>>, vector<1x128x32xbf16>
    %42 = vector.shape_cast %41 : vector<1x128x32xbf16> to vector<128x32xbf16>
    %cst_24 = arith.constant dense<0.000000e+00> : vector<16x32xf32>
    %43 = tpu.matmul %40, %42, %cst_24 {dimension_numbers = #tpu.dot_dimension_numbers<[1], [0], [0], [1], [0, 0, 1, 1], [], []>} : vector<16x128xbf16>, vector<128x32xbf16>, vector<16x32xf32> -> vector<16x32xf32>
    %44 = arith.truncf %43 : vector<16x32xf32> to vector<16x32xbf16>
    %c1 = arith.constant 1 : index
    %c0_25 = arith.constant 0 : index
    %c0_26 = arith.constant 0 : index
    %45 = vector.load %arg7[%c1, %c0_25, %c0_26] : memref<3x32x128xbf16, #tpu.memory_space<vmem>>, vector<1x32x128xbf16>
    %46 = vector.shape_cast %45 : vector<1x32x128xbf16> to vector<32x128xbf16>
    %cst_27 = arith.constant dense<0.000000e+00> : vector<16x128xf32>
    %47 = tpu.matmul %44, %46, %cst_27 {dimension_numbers = #tpu.dot_dimension_numbers<[1], [0], [0], [1], [0, 0, 1, 1], [], []>} : vector<16x32xbf16>, vector<32x128xbf16>, vector<16x128xf32> -> vector<16x128xf32>
    %48 = vector.broadcast %1 : vector<16x1xf32> to vector<16x128xf32>
    %49 = arith.mulf %48, %47 : vector<16x128xf32>
    %50 = arith.select %5, %49, %47 : vector<16x128xi1>, vector<16x128xf32>
    %51 = arith.truncf %50 : vector<16x128xf32> to vector<16x128xbf16>
    %cst_28 = arith.constant dense<0.000000e+00> : vector<16x128xf32>
    %52 = tpu.matmul %0, %51, %cst_28 {dimension_numbers = #tpu.dot_dimension_numbers<[1], [0], [0], [1], [0, 0, 1, 1], [], []>} : vector<16x16xbf16>, vector<16x128xbf16>, vector<16x128xf32> -> vector<16x128xf32>
    %53 = arith.mulf %16, %52 : vector<16x128xf32>
    %54 = arith.select %9, %53, %47 : vector<16x128xi1>, vector<16x128xf32>
    %c1_29 = arith.constant 1 : index
    %c0_30 = arith.constant 0 : index
    %c0_31 = arith.constant 0 : index
    %55 = vector.load %arg8[%c1_29, %c0_30, %c0_31] : memref<3x1x128xf32, #tpu.memory_space<vmem>>, vector<1x1x128xf32>
    %56 = vector.shape_cast %55 : vector<1x1x128xf32> to vector<1x128xf32>
    %57 = vector.broadcast %56 : vector<1x128xf32> to vector<16x128xf32>
    %58 = arith.addf %54, %57 : vector<16x128xf32>
    %cst_32 = arith.constant 0.000000e+00 : f32
    %59 = vector.broadcast %cst_32 : f32 to vector<16x128xf32>
    %60 = arith.maximumf %58, %59 : vector<16x128xf32>
    %61 = arith.truncf %60 : vector<16x128xf32> to vector<16x128xbf16>
    %c1_33 = arith.constant 1 : index
    %c0_34 = arith.constant 0 : index
    %c0_35 = arith.constant 0 : index
    %62 = vector.load %arg9[%c1_33, %c0_34, %c0_35] : memref<3x128x32xbf16, #tpu.memory_space<vmem>>, vector<1x128x32xbf16>
    %63 = vector.shape_cast %62 : vector<1x128x32xbf16> to vector<128x32xbf16>
    %cst_36 = arith.constant dense<0.000000e+00> : vector<16x32xf32>
    %64 = tpu.matmul %61, %63, %cst_36 {dimension_numbers = #tpu.dot_dimension_numbers<[1], [0], [0], [1], [0, 0, 1, 1], [], []>} : vector<16x128xbf16>, vector<128x32xbf16>, vector<16x32xf32> -> vector<16x32xf32>
    %65 = arith.truncf %64 : vector<16x32xf32> to vector<16x32xbf16>
    %c2 = arith.constant 2 : index
    %c0_37 = arith.constant 0 : index
    %c0_38 = arith.constant 0 : index
    %66 = vector.load %arg7[%c2, %c0_37, %c0_38] : memref<3x32x128xbf16, #tpu.memory_space<vmem>>, vector<1x32x128xbf16>
    %67 = vector.shape_cast %66 : vector<1x32x128xbf16> to vector<32x128xbf16>
    %cst_39 = arith.constant dense<0.000000e+00> : vector<16x128xf32>
    %68 = tpu.matmul %65, %67, %cst_39 {dimension_numbers = #tpu.dot_dimension_numbers<[1], [0], [0], [1], [0, 0, 1, 1], [], []>} : vector<16x32xbf16>, vector<32x128xbf16>, vector<16x128xf32> -> vector<16x128xf32>
    %69 = vector.broadcast %1 : vector<16x1xf32> to vector<16x128xf32>
    %70 = arith.mulf %69, %68 : vector<16x128xf32>
    %71 = arith.select %5, %70, %68 : vector<16x128xi1>, vector<16x128xf32>
    %72 = arith.truncf %71 : vector<16x128xf32> to vector<16x128xbf16>
    %cst_40 = arith.constant dense<0.000000e+00> : vector<16x128xf32>
    %73 = tpu.matmul %0, %72, %cst_40 {dimension_numbers = #tpu.dot_dimension_numbers<[1], [0], [0], [1], [0, 0, 1, 1], [], []>} : vector<16x16xbf16>, vector<16x128xbf16>, vector<16x128xf32> -> vector<16x128xf32>
    %74 = arith.mulf %16, %73 : vector<16x128xf32>
    %75 = arith.select %9, %74, %68 : vector<16x128xi1>, vector<16x128xf32>
    %c2_41 = arith.constant 2 : index
    %c0_42 = arith.constant 0 : index
    %c0_43 = arith.constant 0 : index
    %76 = vector.load %arg8[%c2_41, %c0_42, %c0_43] : memref<3x1x128xf32, #tpu.memory_space<vmem>>, vector<1x1x128xf32>
    %77 = vector.shape_cast %76 : vector<1x1x128xf32> to vector<1x128xf32>
    %78 = vector.broadcast %77 : vector<1x128xf32> to vector<16x128xf32>
    %79 = arith.addf %75, %78 : vector<16x128xf32>
    %cst_44 = arith.constant 0.000000e+00 : f32
    %80 = vector.broadcast %cst_44 : f32 to vector<16x128xf32>
    %81 = arith.maximumf %79, %80 : vector<16x128xf32>
    %82 = arith.truncf %81 : vector<16x128xf32> to vector<16x128xbf16>
    %c2_45 = arith.constant 2 : index
    %c0_46 = arith.constant 0 : index
    %c0_47 = arith.constant 0 : index
    %83 = vector.load %arg9[%c2_45, %c0_46, %c0_47] : memref<3x128x32xbf16, #tpu.memory_space<vmem>>, vector<1x128x32xbf16>
    %84 = vector.shape_cast %83 : vector<1x128x32xbf16> to vector<128x32xbf16>
    %cst_48 = arith.constant dense<0.000000e+00> : vector<16x32xf32>
    %85 = tpu.matmul %82, %84, %cst_48 {dimension_numbers = #tpu.dot_dimension_numbers<[1], [0], [0], [1], [0, 0, 1, 1], [], []>} : vector<16x128xbf16>, vector<128x32xbf16>, vector<16x32xf32> -> vector<16x32xf32>
    %c0_49 = arith.constant 0 : index
    %86 = memref.load %arg0[%c0_49] : memref<2xf32, #tpu.memory_space<smem>>
    %c1_50 = arith.constant 1 : index
    %87 = memref.load %arg0[%c1_50] : memref<2xf32, #tpu.memory_space<smem>>
    %88 = vector.broadcast %86 : f32 to vector<16x32xf32>
    %89 = arith.mulf %88, %43 : vector<16x32xf32>
    %90 = vector.broadcast %87 : f32 to vector<16x32xf32>
    %91 = arith.mulf %90, %64 : vector<16x32xf32>
    %92 = arith.maximumf %85, %89 : vector<16x32xf32>
    %93 = arith.maximumf %92, %91 : vector<16x32xf32>
    %cst_51 = arith.constant 0.000000e+00 : f32
    %94 = vector.broadcast %cst_51 : f32 to vector<16x32xf32>
    %95 = arith.maximumf %93, %94 : vector<16x32xf32>
    %96 = arith.addf %89, %91 : vector<16x32xf32>
    %97 = arith.addf %96, %85 : vector<16x32xf32>
    %cst_52 = arith.constant 0.333333343 : f32
    %98 = vector.broadcast %cst_52 : f32 to vector<16x32xf32>
    %99 = arith.mulf %97, %98 : vector<16x32xf32>
    %cst_53 = arith.constant 0.000000e+00 : f32
    %100 = vector.broadcast %cst_53 : f32 to vector<16x32xf32>
    %101 = arith.maximumf %99, %100 : vector<16x32xf32>
    %cst_54 = arith.constant 0.000000e+00 : f32
    %102 = vector.broadcast %cst_54 : f32 to vector<16x32xf32>
    %103 = arith.maximumf %85, %102 : vector<16x32xf32>
    %cst_55 = arith.constant 0.000000e+00 : f32
    %104 = vector.broadcast %cst_55 : f32 to vector<16x32xf32>
    %105 = arith.maximumf %89, %104 : vector<16x32xf32>
    %cst_56 = arith.constant 0.000000e+00 : f32
    %106 = vector.broadcast %cst_56 : f32 to vector<16x32xf32>
    %107 = arith.maximumf %91, %106 : vector<16x32xf32>
    %108 = tpu.concatenate %95, %101, %103, %105, %107 in 1 : vector<16x32xf32>, vector<16x32xf32>, vector<16x32xf32>, vector<16x32xf32>, vector<16x32xf32> -> vector<16x160xf32>
    %109 = arith.truncf %108 : vector<16x160xf32> to vector<16x160xbf16>
    %c0_57 = arith.constant 0 : index
    %c0_58 = arith.constant 0 : index
    %110 = vector.load %arg10[%c0_57, %c0_58] : memref<160x32xbf16, #tpu.memory_space<vmem>>, vector<160x32xbf16>
    %cst_59 = arith.constant dense<0.000000e+00> : vector<16x32xf32>
    %111 = tpu.matmul %109, %110, %cst_59 {dimension_numbers = #tpu.dot_dimension_numbers<[1], [0], [0], [1], [0, 0, 1, 1], [], []>} : vector<16x160xbf16>, vector<160x32xbf16>, vector<16x32xf32> -> vector<16x32xf32>
    %c0_60 = arith.constant 0 : index
    %c0_61 = arith.constant 0 : index
    %112 = vector.load %arg11[%c0_60, %c0_61] : memref<1x32xf32, #tpu.memory_space<vmem>>, vector<1x32xf32>
    %113 = vector.broadcast %112 : vector<1x32xf32> to vector<16x32xf32>
    %114 = arith.addf %111, %113 : vector<16x32xf32>
    %c0_62 = arith.constant 0 : index
    %c0_63 = arith.constant 0 : index
    %115 = vector.load %arg12[%c0_62, %c0_63] : memref<2x16xbf16, #tpu.memory_space<vmem>>, vector<2x16xbf16>
    %116 = arith.truncf %114 : vector<16x32xf32> to vector<16x32xbf16>
    %cst_64 = arith.constant dense<0.000000e+00> : vector<2x32xf32>
    %117 = tpu.matmul %115, %116, %cst_64 {dimension_numbers = #tpu.dot_dimension_numbers<[1], [0], [0], [1], [0, 0, 1, 1], [], []>} : vector<2x16xbf16>, vector<16x32xbf16>, vector<2x32xf32> -> vector<2x32xf32>
    %118 = arith.truncf %117 : vector<2x32xf32> to vector<2x32xbf16>
    %c0_65 = arith.constant 0 : index
    %c0_66 = arith.constant 0 : index
    %119 = vector.load %arg13[%c0_65, %c0_66] : memref<32x4xbf16, #tpu.memory_space<vmem>>, vector<32x4xbf16>
    %cst_67 = arith.constant dense<0.000000e+00> : vector<2x4xf32>
    %120 = tpu.matmul %118, %119, %cst_67 {dimension_numbers = #tpu.dot_dimension_numbers<[1], [0], [0], [1], [0, 0, 1, 1], [], []>} : vector<2x32xbf16>, vector<32x4xbf16>, vector<2x4xf32> -> vector<2x4xf32>
    %c0_68 = arith.constant 0 : index
    %c0_69 = arith.constant 0 : index
    %121 = vector.load %arg14[%c0_68, %c0_69] : memref<1x4xf32, #tpu.memory_space<vmem>>, vector<1x4xf32>
    %122 = vector.broadcast %121 : vector<1x4xf32> to vector<2x4xf32>
    %123 = arith.addf %120, %122 : vector<2x4xf32>
    %c0_70 = arith.constant 0 : index
    %c0_71 = arith.constant 0 : index
    %124 = vector.load %arg15[%c0_70, %c0_71] : memref<2x4xf32, #tpu.memory_space<vmem>>, vector<2x4xf32>
    tpu.vector_store %arg15[%c0_70, %c0_71], %123 {strides = array<i32>} : memref<2x4xf32, #tpu.memory_space<vmem>>, vector<2x4xf32>,
    return
  }
}

</mosaic_0001>

<bundles_post_ra>
// kernel: nac_searchspace_forward.1
= control target key start
LH: loop header
LB: loop body
LE: loop exit
PB: predicated region body
PF: predicated region fallthrough
CT: control target
= control target key end

     0   :  { %20 = vsyncpa [#allocation4], 0  ;;  %s1526_s0 = inlined_call_operand.vmem [shape: f32[2], index: 0, kind: input, shape index: {}]   ;;  %s1527_s1 = inlined_call_operand.vmem [shape: bf16[16,8], index: 1, kind: input, shape index: {}]   ;;  %s1528_s2 = inlined_call_operand.vmem [shape: bf16[16,16], index: 2, kind: input, shape index: {}]   ;;  %s1529_s3 = inlined_call_operand.vmem [shape: f32[16,1], index: 3, kind: input, shape index: {}]   ;;  %s1530_s4 = inlined_call_operand.vmem [shape: f32[16,1], index: 4, kind: input, shape index: {}]   ;;  %s1531_s5 = inlined_call_operand.vmem [shape: bf16[8,32], index: 5, kind: input, shape index: {}]   ;;  %s1532_s6 = inlined_call_operand.vmem [shape: f32[1,32], index: 6, kind: input, shape index: {}]   ;;  %s1533_s7 = inlined_call_operand.vmem [shape: bf16[3,32,128], index: 7, kind: input, shape index: {}]   ;;  %s1534_s8 = inlined_call_operand.vmem [shape: f32[3,1,128], index: 8, kind: input, shape index: {}]   ;;  %s1535_s9 = inlined_call_operand.vmem [shape: bf16[3,128,32], index: 9, kind: input, shape index: {}]   ;;  %s1536_s10 = inlined_call_operand.vmem [shape: bf16[160,32], index: 10, kind: input, shape index: {}]   ;;  %s1537_s11 = inlined_call_operand.vmem [shape: f32[1,32], index: 11, kind: input, shape index: {}]   ;;  %s1538_s12 = inlined_call_operand.vmem [shape: bf16[2,16], index: 12, kind: input, shape index: {}]   ;;  %s1539_s13 = inlined_call_operand.vmem [shape: bf16[32,4], index: 13, kind: input, shape index: {}]   ;;  %s1540_s14 = inlined_call_operand.vmem [shape: f32[1,4], index: 14, kind: input, shape index: {}]   ;;  %s1541_s15 = inlined_call_operand.hbm [shape: f32[2,4], index: 15, kind: output, shape index: {}]  }
   0x1   :  { %21 = vsyncpa [#allocation3], 0  ;;  %s27_s20 = sshll.u32 %s1526_s0, 4  ;;  %s1175_s21 = smov [#allocation2]   ;;  %s28_s20 = int_to_ptr.vmem [resolvable:$true] %s27_s20 }
   0x2   :  { %30 = dma.vmem_to_smem %s28_s20, 16, %s1175_s21, [#allocation4]  }
   0x3   :  { %1171 = dma.done.wait [#allocation4], 16  }
   0x4   :  { %1172 = vsyncadd [#allocation4], 4294967280 }
   0x5   :  { %63 = sfence }
   0x6   :  { %v102_v0 = vld [vmem:[%s1531_s5] sm:$0xf]  ;;  %vm116_vm0 = vcmask 1043456   ;;  %vm112_vm1 = vcmask 64512   ;;  %v1065_v3 = vld [vmem:[%s1533_s7 + $0x8] sm:$0xff]  ;;  %v1176_v7 = vmov 0   ;;  %v71_v22 = vlaneseq }
   0x7   :  { %v118_v1 = vsel %vm116_vm0, %v102_v0, 0  ;;  %v1063_v2 = vld [vmem:[%s1527_s1] sm:$0xff]  ;;  %161 = vmatpush.bf16.msra.mxu1 %v1065_v3  ;;  %1113 = vset.pattern.permute.xlu1 %v1176_v7  ;;  %v70_v8 = vld [vmem:[%s1530_s4 + $0x8] sm:$0xff]  ;;  %vm151_vm2 = vcmask 261120   ;;  %v1073_v16 = vld [vmem:[%s1535_s9 + $0x38] sm:$0xff]  ;;  %vm179_vm4 = vcmask 130048  }
   0x8   :  { %127 = vmatpush.bf16.msra.mxu0 %v118_v1  ;;  %v1064_v4 = vld [vmem:[%s1533_s7] sm:$0xff]  ;;  %1112 = vset.pattern.permute.xlu0 %v1176_v7  ;;  %v68_v9 = vld [vmem:[%s1529_s3 + $0x8] sm:$0xff]  ;;  %v1072_v17 = vld [vmem:[%s1535_s9 + $0x30] sm:$0xff]  ;;  %v1306_v23 = vand.u32 127, %v71_v22  ;;  %s1177_s23 = smov 96   ;;  %s1010_s30 = sld [smem:[#allocation2 + $0x1]] }
   0x9   :  { %v69_v5 = vld [vmem:[%s1530_s4] sm:$0xff]  ;;  %274 = vmatpush.bf16.msra.mxu3 %v1073_v16  ;;  %v1071_v18 = vld [vmem:[%s1535_s9 + $0x28] sm:$0xff]  ;;  %v1069_v32 = vld [vmem:[%s1535_s9 + $0x18] sm:$0xff]  ;;  %s1178_s5 = smov 32   ;;  %s1179_s29 = smov 64   ;;  %vm636_vm7 = vcmask 523264  }
   0xa   :  { %v67_v6 = vld [vmem:[%s1529_s3] sm:$0xff]  ;;  %78 = vperm.xlu1 %1113, %v69_v5   ;;  %vm73_vm3 = vcmp.lt.s32.totalorder %v1306_v23, 32  ;;  %v1068_v33 = vld [vmem:[%s1535_s9 + $0x10] sm:$0xff]  ;;  %v1067_v34 = vld [vmem:[%s1535_s9 + $0x8] sm:$0xff]  ;;  %vm74_vm5 = vcmp.lt.s32.totalorder %v1306_v23, 64  ;;  %vm75_vm6 = vcmp.lt.s32.totalorder %v1306_v23, 96 }
   0xb   :  { %837 = vmatmul.msk.bf16.vlgmr.msra.gmra.mxu0 %vm112_vm1, %v1063_v2  ;;  %162 = vmatpush.bf16.msra.mxu1 %v1064_v4  ;;  %v1129_v11 = vld [vmem:[%s1532_s6] ss:$0 sm:$0xff]  ;;  %v1075_v54 = vld [vmem:[%s1533_s7 + $0x18] sm:$0xff]  ;;  %v1074_v55 = vld [vmem:[%s1533_s7 + $0x10] sm:$0xff]  ;;  %s582_s3 = sld [smem:[#allocation2]]  ;;  %vm639_vm8 = vcmask 785408  }
   0xc   :  { %90 = vperm.xlu0 %1112, %v67_v6   ;;  %v1070_v19 = vld [vmem:[%s1535_s9 + $0x20] sm:$0xff]  ;;  %315 = vmatpush.bf16.msrb.mxu0 %v1075_v54  ;;  %v1083_v1 = vld [vmem:[%s1535_s9 + $0x78] sm:$0xff]  ;;  %v1082_v2 = vld [vmem:[%s1535_s9 + $0x70] sm:$0xff]  ;;  %s1180_s24 = smov [#allocation5]   ;;  %s823_s6 = sshll.u32 %s1541_s15, 4  ;;  %vm814_vm9 = vcmask 25600   ;;  %s824_s6 = int_to_ptr.hbm [resolvable:$true] %s823_s6 }
   0xd   :  { %275 = vmatpush.bf16.msra.mxu3 %v1072_v17  ;;  %v1320_v31 = vld [vmem:[%s1528_s2] sm:$0xff]  ;;  %v1081_v3 = vld [vmem:[%s1535_s9 + $0x68] sm:$0xff] }
   0xe   :  { %v1066_v35 = vld [vmem:[%s1535_s9] sm:$0xff]  ;;  %v1099_v23 = vld [vmem:[%s1536_s10 + $0x28] sm:$0xff] }
   0xf   :  { %v1130_v43 = vld [vmem:[%s1534_s8] ss:$0 sm:$0xff]  ;;  %421 = vmatpush.bf16.msrb.mxu1 %v1083_v1 }
  0x10   :  { %316 = vmatpush.bf16.msrb.mxu0 %v1074_v55  ;;  %v1080_v4 = vld [vmem:[%s1535_s9 + $0x60] sm:$0xff] }
  0x11   :  { %276 = vmatpush.bf16.msra.mxu3 %v1071_v18  ;;  %v584_v57 = vstv %s582_s3  ;;  %v1131_v18 = vld [vmem:[%s1534_s8 + $0x1] ss:$0 sm:$0xff] }
  0x12   :  { %83 = vperm.xlu1 %1113, %v70_v8  }
  0x13   :  { %422 = vmatpush.bf16.msrb.mxu1 %v1082_v2 }
  0x14   :  { %95 = vperm.xlu0 %1112, %v68_v9  }
  0x15   :  { %277 = vmatpush.bf16.msra.mxu3 %v1070_v19 }
  0x17   :  { %423 = vmatpush.bf16.msrb.mxu1 %v1081_v3 }
  0x19   :  { %278 = vmatpush.bf16.msra.mxu3 %v1069_v32  ;;  %v1085_v32 = vld [vmem:[%s1533_s7 + $0x28] sm:$0xff] }
  0x1a   :  { %462 = vmatpush.bf16.msra.mxu0 %v1085_v32 }
  0x1b   :  { %424 = vmatpush.bf16.msrb.mxu1 %v1080_v4 }
  0x1d   :  { %279 = vmatpush.bf16.msra.mxu3 %v1068_v33  ;;  %v1084_v33 = vld [vmem:[%s1533_s7 + $0x20] sm:$0xff] }
  0x1e   :  { %463 = vmatpush.bf16.msra.mxu0 %v1084_v33 }
  0x21   :  { %280 = vmatpush.bf16.msra.mxu3 %v1067_v34 }
  0x25   :  { %281 = vmatpush.bf16.msra.mxu3 %v1066_v35 }
  0x7c   :  { %v79_v36 = vpop.permute.xlu1 %78 }
  0x7d   :  { %v86_v37 = vsel %vm74_vm5, %v79_v36, 1.0 }
  0x7e   :  { %v1304_v20 = vpop.permute.xlu0 %90 }
  0x7f   :  { %v1340_v40 = vsel %vm73_vm3, %v1304_v20, %v86_v37 }
  0x84   :  { %v84_v39 = vpop.permute.xlu1 %83 }
  0x85   :  { %v87_v42 = vsel %vm74_vm5, %v84_v39, 1.0  ;;  %v1092_v39 = vld [vmem:[%s1535_s9 + $0xb0] sm:$0xff] }
  0x86   :  { %v1309_v25 = vpop.permute.xlu0 %95 }
  0x87   :  { %v1352_v45 = vsel %vm73_vm3, %v1309_v25, %v87_v42  ;;  %v1091_v42 = vld [vmem:[%s1535_s9 + $0xa8] sm:$0xff] }
  0x88   :  { %v129_v10 = vpop.f32.mrf.mxu0 }
  0x89   :  { %v130_v13 = vadd.f32 %v1129_v11, %v129_v10 }
  0x90   :  { %v131_v12 = vpop.f32.mrf.mxu0 }
  0x91   :  { %v132_v14 = vadd.f32 %v1129_v11, %v131_v12  ;;  %v1079_v12 = vld [vmem:[%s1535_s9 + $0x58] sm:$0xff] }
  0x92   :  { %425 = vmatpush.bf16.msrb.mxu1 %v1079_v12 }
  0x93   :  { %v134_v15 = vpack.c.bf16 %v132_v14, %v130_v13  ;;  %v1078_v13 = vld [vmem:[%s1535_s9 + $0x50] sm:$0xff]  ;;  %v1077_v14 = vld [vmem:[%s1535_s9 + $0x48] sm:$0xff] }
  0x95   :  { %846 = vmatmul.msk.bf16.vlgmr.msra.gmra.mxu1 %vm151_vm2, %v134_v15  ;;  %v1076_v15 = vld [vmem:[%s1535_s9 + $0x40] sm:$0xff] }
  0x96   :  { %426 = vmatpush.bf16.msrb.mxu1 %v1078_v13 }
  0x9a   :  { %427 = vmatpush.bf16.msrb.mxu1 %v1077_v14  ;;  %v1097_v14 = vld [vmem:[%s1536_s10 + $0x18] sm:$0xff] }
  0x9e   :  { %428 = vmatpush.bf16.msrb.mxu1 %v1076_v15 }
 0x112   :  { %v164_v21 = vpop.f32.mrf.mxu1 }
 0x113   :  { %v169_v24 = vmul.f32 %v164_v21, %v1304_v20 }
 0x115   :  { %v171_v28 = vsel %vm73_vm3, %v169_v24, %v164_v21 }
 0x11a   :  { %v166_v26 = vpop.f32.mrf.mxu1 }
 0x11b   :  { %v170_v27 = vmul.f32 %v166_v26, %v1309_v25 }
 0x11d   :  { %v172_v29 = vsel %vm73_vm3, %v170_v27, %v166_v26 }
 0x11e   :  { %v173_v30 = vpack.c.bf16 %v172_v29, %v171_v28 }
 0x120   :  { %190 = vmatpush.bf16.msra.mxu2 %v173_v30 }
 0x123   :  { %851 = vmatmul.msk.bf16.vlgmr.msra.gmra.mxu2 %vm179_vm4, %v1320_v31 }
 0x1a6   :  { %v192_v38 = vpop.f32.mrf.mxu2 }
 0x1a7   :  { %v197_v41 = vmul.f32 %v192_v38, %v1340_v40  ;;  %v1093_v38 = vld [vmem:[%s1535_s9 + $0xb8] sm:$0xff] }
 0x1a8   :  { %568 = vmatpush.bf16.msrb.mxu3 %v1093_v38 }
 0x1a9   :  { %v199_v44 = vsel %vm75_vm6, %v197_v41, %v164_v21 }
 0x1aa   :  { %v205_v48 = vadd.f32 %v1130_v43, %v199_v44 }
 0x1ac   :  { %v207_v51 = vmax.f32 %v205_v48, 0.0  ;;  %569 = vmatpush.bf16.msrb.mxu3 %v1092_v39  ;;  %v1103_v48 = vld [vmem:[%s1536_s10 + $0x48] sm:$0xff] }
 0x1ae   :  { %v194_v46 = vpop.f32.mrf.mxu2 }
 0x1af   :  { %v198_v47 = vmul.f32 %v194_v46, %v1352_v45 }
 0x1b0   :  { %570 = vmatpush.bf16.msrb.mxu3 %v1091_v42 }
 0x1b1   :  { %v200_v49 = vsel %vm75_vm6, %v198_v47, %v166_v26 }
 0x1b2   :  { %v206_v50 = vadd.f32 %v1130_v43, %v200_v49 }
 0x1b4   :  { %v208_v52 = vmax.f32 %v206_v50, 0.0  ;;  %v587_v50 = vstv %s1010_s30 }
 0x1b6   :  { %v209_v53 = vpack.c.bf16 %v208_v52, %v207_v51 }
 0x1b8   :  { %282 = vmatmul.bf16.vlgmr.msra.gmra.mxu3 %v209_v53 }
 0x23b   :  { %v283_v56 = vpop.f32.mrf.mxu3 }
 0x23c   :  { %v1363_v58 = vmul.f32 %v584_v57, %v283_v56 }
 0x23e   :  { %v606_v62 = vmax.f32 %v1363_v58, 0.0 }
 0x243   :  { %v285_v59 = vpop.f32.mrf.mxu3 }
 0x244   :  { %v288_v60 = vpack.c.bf16 %v285_v59, %v283_v56  ;;  %v1365_v61 = vmul.f32 %v584_v57, %v285_v59  ;;  %v1089_v56 = vld [vmem:[%s1535_s9 + $0x98] sm:$0xff]  ;;  %v1087_v57 = vld [vmem:[%s1535_s9 + $0x88] sm:$0xff]  ;;  %v1086_v59 = vld [vmem:[%s1535_s9 + $0x80] sm:$0xff] }
 0x246   :  { %896 = vmatmul.msk.bf16.vlgmr.msrb.gmra.mxu0 %vm151_vm2, %v288_v60  ;;  %v607_v63 = vmax.f32 %v1365_v61, 0.0 }
 0x248   :  { %v1124_v0 = vpack.i.bf16 %v607_v63, %v606_v62  ;;  %v1132_v63 = vld [vmem:[%s1534_s8 + $0x2] ss:$0 sm:$0xff]  ;;  %s821_s8 = sshll.u32 %s1180_s24, 4  ;;  %s822_s8 = int_to_ptr.vmem [resolvable:$true] %s821_s8 }
 0x24a   :  { %1125 = vrot.lane.b32.xlu0 %v1124_v0, %s1177_s23 }
 0x2bc   :  { %v1126_v39 = vpop.permute.xlu0 %1125 }
 0x2c3   :  { %v318_v5 = vpop.f32.mrf.mxu0 }
 0x2c4   :  { %v323_v6 = vmul.f32 %v318_v5, %v1304_v20 }
 0x2c6   :  { %v325_v9 = vsel %vm73_vm3, %v323_v6, %v318_v5 }
 0x2cb   :  { %v320_v7 = vpop.f32.mrf.mxu0 }
 0x2cc   :  { %v324_v8 = vmul.f32 %v320_v7, %v1309_v25 }
 0x2ce   :  { %v326_v10 = vsel %vm73_vm3, %v324_v8, %v320_v7 }
 0x2cf   :  { %v327_v11 = vpack.c.bf16 %v326_v10, %v325_v9  ;;  %v1100_v9 = vld [vmem:[%s1536_s10 + $0x30] sm:$0xff] }
 0x2d1   :  { %335 = vmatpush.bf16.msrb.mxu2 %v327_v11  ;;  %v1098_v11 = vld [vmem:[%s1536_s10 + $0x20] sm:$0xff] }
 0x2d4   :  { %897 = vmatmul.msk.bf16.vlgmr.msrb.gmra.mxu2 %vm179_vm4, %v1320_v31 }
 0x357   :  { %v337_v16 = vpop.f32.mrf.mxu2 }
 0x358   :  { %v342_v17 = vmul.f32 %v337_v16, %v1340_v40 }
 0x35a   :  { %v344_v19 = vsel %vm75_vm6, %v342_v17, %v318_v5 }
 0x35b   :  { %v351_v24 = vadd.f32 %v1131_v18, %v344_v19 }
 0x35d   :  { %v353_v28 = vmax.f32 %v351_v24, 0.0 }
 0x35f   :  { %v339_v21 = vpop.f32.mrf.mxu2 }
 0x360   :  { %v343_v22 = vmul.f32 %v339_v21, %v1352_v45 }
 0x362   :  { %v345_v26 = vsel %vm75_vm6, %v343_v22, %v320_v7 }
 0x363   :  { %v352_v27 = vadd.f32 %v1131_v18, %v345_v26 }
 0x365   :  { %v354_v29 = vmax.f32 %v352_v27, 0.0 }
 0x367   :  { %v355_v30 = vpack.c.bf16 %v354_v29, %v353_v28  ;;  %v1096_v28 = vld [vmem:[%s1536_s10 + $0x10] sm:$0xff]  ;;  %v1095_v29 = vld [vmem:[%s1536_s10 + $0x8] sm:$0xff] }
 0x369   :  { %429 = vmatmul.bf16.vlgmr.msrb.gmra.mxu1 %v355_v30  ;;  %v1094_v30 = vld [vmem:[%s1536_s10] sm:$0xff] }
 0x3e6   :  { %v430_v34 = vpop.f32.mrf.mxu1 }
 0x3e7   :  { %v1446_v52 = vmul.f32 %v587_v50, %v430_v34 }
 0x3e9   :  { %v608_v54 = vmax.f32 %v1446_v52, 0.0  ;;  %v596_v10 = vadd.f32 %v1446_v52, %v1363_v58 }
 0x3ee   :  { %v432_v35 = vpop.f32.mrf.mxu1 }
 0x3ef   :  { %v435_v36 = vpack.c.bf16 %v432_v35, %v430_v34  ;;  %v1444_v51 = vmul.f32 %v587_v50, %v432_v35 }
 0x3f1   :  { %959 = vmatmul.msk.bf16.vlgmr.msra.gmra.mxu0 %vm151_vm2, %v435_v36  ;;  %v609_v53 = vmax.f32 %v1444_v51, 0.0  ;;  %v597_v13 = vadd.f32 %v1444_v51, %v1365_v61 }
 0x3f3   :  { %v643_v55 = vpack.c.bf16 %v609_v53, %v608_v54 }
 0x46e   :  { %v465_v37 = vpop.f32.mrf.mxu0 }
 0x46f   :  { %v470_v41 = vmul.f32 %v465_v37, %v1304_v20  ;;  %v1090_v20 = vld [vmem:[%s1535_s9 + $0xa0] sm:$0xff] }
 0x470   :  { %571 = vmatpush.bf16.msrb.mxu3 %v1090_v20 }
 0x471   :  { %v472_v46 = vsel %vm73_vm3, %v470_v41, %v465_v37 }
 0x474   :  { %572 = vmatpush.bf16.msrb.mxu3 %v1089_v56 }
 0x476   :  { %v467_v43 = vpop.f32.mrf.mxu0 }
 0x477   :  { %v471_v44 = vmul.f32 %v467_v43, %v1309_v25  ;;  %v1102_v25 = vld [vmem:[%s1536_s10 + $0x40] sm:$0xff] }
 0x479   :  { %v473_v47 = vsel %vm73_vm3, %v471_v44, %v467_v43 }
 0x47a   :  { %v474_v49 = vpack.c.bf16 %v473_v47, %v472_v46  ;;  %v1128_v47 = vunpack.i.h.bf16 %v1126_v39 }
 0x47c   :  { %482 = vmatpush.bf16.msra.mxu2 %v474_v49 }
 0x47f   :  { %960 = vmatmul.msk.bf16.vlgmr.msra.gmra.mxu2 %vm179_vm4, %v1320_v31  ;;  %v1088_v31 = vld [vmem:[%s1535_s9 + $0x90] sm:$0xff] }
 0x480   :  { %751 = vmatpush.bf16.msrb.mxu2 %v1103_v48  ;;  %573 = vmatpush.bf16.msrb.mxu3 %v1088_v31  ;;  %v1127_v48 = vunpack.i.l.bf16 %v1126_v39 }
 0x484   :  { %752 = vmatpush.bf16.msrb.mxu2 %v1102_v25  ;;  %574 = vmatpush.bf16.msrb.mxu3 %v1087_v57 }
 0x488   :  { %575 = vmatpush.bf16.msrb.mxu3 %v1086_v59 }
 0x48f   :  { %1051 = vmatmul.msk.bf16.vlgmr.msrb.gmra.mxu2 %vm151_vm2, %v643_v55  ;;  %v1133_v55 = vld [vmem:[%s1537_s11] ss:$0 sm:$0xff] }
 0x502   :  { %v484_v60 = vpop.f32.mrf.mxu2 }
 0x503   :  { %v489_v62 = vmul.f32 %v484_v60, %v1340_v40  ;;  %v1101_v40 = vld [vmem:[%s1536_s10 + $0x38] sm:$0xff] }
 0x504   :  { %731 = vmatpush.bf16.msrb.mxu0 %v1101_v40 }
 0x505   :  { %v491_v0 = vsel %vm75_vm6, %v489_v62, %v465_v37 }
 0x506   :  { %v498_v3 = vadd.f32 %v1132_v63, %v491_v0  ;;  %v759_v0 = vld [vmem:[%s1538_s12] sm:$0x1] }
 0x508   :  { %v500_v6 = vmax.f32 %v498_v3, 0.0  ;;  %732 = vmatpush.bf16.msrb.mxu0 %v1100_v9 }
 0x50a   :  { %v486_v1 = vpop.f32.mrf.mxu2 }
 0x50b   :  { %v490_v2 = vmul.f32 %v486_v1, %v1352_v45  ;;  %v1104_v1 = vld [vmem:[%s1539_s13] sm:$0xff] }
 0x50c   :  { %733 = vmatpush.bf16.msrb.mxu0 %v1099_v23 }
 0x50d   :  { %v492_v4 = vsel %vm75_vm6, %v490_v2, %v467_v43 }
 0x50e   :  { %v499_v5 = vadd.f32 %v1132_v63, %v492_v4 }
 0x510   :  { %v501_v7 = vmax.f32 %v499_v5, 0.0  ;;  %734 = vmatpush.bf16.msrb.mxu0 %v1098_v11  ;;  %v1134_v5 = vld [vmem:[%s1540_s14] ss:$0 sm:$0xff] }
 0x512   :  { %v502_v8 = vpack.c.bf16 %v501_v7, %v500_v6  ;;  %v754_v53 = vpop.f32.mrf.mxu2 }
 0x514   :  { %576 = vmatmul.bf16.vlgmr.msrb.gmra.mxu3 %v502_v8  ;;  %735 = vmatpush.bf16.msrb.mxu0 %v1097_v14 }
 0x518   :  { %736 = vmatpush.bf16.msrb.mxu0 %v1096_v28 }
 0x51a   :  { %v756_v59 = vpop.f32.mrf.mxu2 }
 0x51c   :  { %737 = vmatpush.bf16.msrb.mxu0 %v1095_v29 }
 0x520   :  { %738 = vmatpush.bf16.msrb.mxu0 %v1094_v30 }
 0x597   :  { %v577_v45 = vpop.f32.mrf.mxu3 }
 0x598   :  { %v598_v12 = vadd.f32 %v596_v10, %v577_v45  ;;  %v604_v26 = vmax.f32 %v577_v45, 0.0  ;;  %v590_v32 = vmax.f32 %v577_v45, %v1363_v58 }
 0x59a   :  { %v600_v17 = vmul.f32 0.33333334, %v598_v12  ;;  %v592_v35 = vmax.f32 %v590_v32, %v1446_v52  ;;  %v1105_v52 = vld [vmem:[%s1539_s13 + $0x8] sm:$0xff] }
 0x59b   :  { %807 = vmatpush.bf16.msra.mxu2 %v1105_v52 }
 0x59c   :  { %v602_v21 = vmax.f32 %v600_v17, 0.0  ;;  %v594_v41 = vmax.f32 %v592_v35, 0.0 }
 0x59f   :  { %v579_v15 = vpop.f32.mrf.mxu3  ;;  %808 = vmatpush.bf16.msra.mxu2 %v1104_v1 }
 0x5a0   :  { %v599_v16 = vadd.f32 %v597_v13, %v579_v15  ;;  %v605_v24 = vmax.f32 %v579_v15, 0.0  ;;  %v591_v33 = vmax.f32 %v579_v15, %v1365_v61 }
 0x5a2   :  { %v601_v18 = vmul.f32 0.33333334, %v599_v16  ;;  %v1119_v27 = vpack.i.bf16 %v605_v24, %v604_v26  ;;  %v593_v36 = vmax.f32 %v591_v33, %v1444_v51 }
 0x5a4   :  { %v603_v19 = vmax.f32 %v601_v18, 0.0  ;;  %v595_v42 = vmax.f32 %v593_v36, 0.0 }
 0x5a6   :  { %v1114_v22 = vpack.i.bf16 %v603_v19, %v602_v21 }
 0x5a8   :  { %1115 = vrot.lane.b32.xlu2 %v1114_v22, %s1178_s5 }
 0x5b0   :  { %1120 = vrot.lane.b32.xlu2 %v1119_v27, %s1179_s29 }
 0x602   :  { %v1116_v34 = vpop.permute.xlu2 %1115 }
 0x603   :  { %v1118_v37 = vunpack.i.h.bf16 %v1116_v34  ;;  %v1117_v38 = vunpack.i.l.bf16 %v1116_v34 }
 0x605   :  { %v634_v58 = vsel %vm151_vm2, %v594_v41, %v1117_v38  ;;  %v635_v61 = vsel %vm151_vm2, %v595_v42, %v1118_v37 }
 0x60a   :  { %v1121_v43 = vpop.permute.xlu2 %1120 }
 0x60b   :  { %v1123_v44 = vunpack.i.h.bf16 %v1121_v43  ;;  %v1122_v46 = vunpack.i.l.bf16 %v1121_v43 }
 0x60d   :  { %v637_v20 = vsel %vm636_vm7, %v634_v58, %v1122_v46  ;;  %v638_v49 = vsel %vm636_vm7, %v635_v61, %v1123_v44 }
 0x60e   :  { %v640_v25 = vsel %vm639_vm8, %v637_v20, %v1127_v48  ;;  %v641_v50 = vsel %vm639_vm8, %v638_v49, %v1128_v47 }
 0x60f   :  { %v642_v51 = vpack.c.bf16 %v641_v50, %v640_v25 }
 0x611   :  { %739 = vmatmul.bf16.vlgmr.msrb.gmra.mxu0 %v642_v51 }
 0x68e   :  { %v740_v54 = vpop.f32.mrf.mxu0 }
 0x68f   :  { %v741_v56 = vadd.f32 %v1133_v55, %v740_v54 }
 0x691   :  { %v755_v60 = vadd.f32 %v754_v53, %v741_v56 }
 0x696   :  { %v742_v31 = vpop.f32.mrf.mxu0 }
 0x697   :  { %v743_v57 = vadd.f32 %v1133_v55, %v742_v31 }
 0x699   :  { %v757_v62 = vadd.f32 %v756_v59, %v743_v57 }
 0x69b   :  { %v760_v63 = vpack.c.bf16 %v757_v62, %v755_v60 }
 0x69d   :  { %771 = vmatpush.bf16.msra.mxu1 %v760_v63 }
 0x6a0   :  { %1052 = vmatmul.msk.bf16.vlgmr.msra.gmra.mxu1 %vm179_vm4, %v759_v0 }
 0x71d   :  { %v773_v2 = vpop.f32.mrf.mxu1 }
 0x71e   :  { %v777_v3 = vpack.c.bf16 %v773_v2, %v773_v2 }
 0x720   :  { %1061 = vmatmul.msk.bf16.vlgmr.msra.gmra.mxu2 %vm151_vm2, %v777_v3 }
 0x725   :  { %v775_v4 = vpop.f32.mrf.mxu1 }
 0x7a3   :  { %v810_v6 = vpop.f32.mrf.mxu2 }
 0x7a4   :  { %v811_v7 = vadd.f32 %v1134_v5, %v810_v6 }
 0x7a6   :  { %815 = vst.msk [vmem:[#allocation5] sm:$0x3] %vm814_vm9, %v811_v7 }
 0x7a7   :  { %826 = dma.vmem_to_hbm [thread:$0]  %s822_s8, 32, %s824_s6, [#allocation3]  }
 0x7ab   :  { %v812_v8 = vpop.f32.mrf.mxu2 }
 0x7ac   :  { %1173 = dma.done.wait [#allocation3], 32  }
 0x7ad   :  { %1174 = vsyncadd [#allocation3], 4294967264 }
 0x7ae   :  { %831 = vsyncpa [#allocation3], 1 }
 0x7af   :  { %832 = vsyncpa [#allocation4], 1 }

</bundles_post_ra>
